<compile_context>
chip_gen: v5e
topology: v5e:2x2
jax: 0.10.0
libtpu: 0.0.40
codegen_flags: <defaults>
</compile_context>

<pallas_src>
import functools

import jax
import jax.numpy as jnp
from jax.experimental import pallas as pl
from jax.experimental.pallas import tpu as pltpu


def _interpret_kernel(x_ref, y_ref, w_ref, wn_ref, out_ref, *, num_asp, batch, tb):
    """One batch tile: x [TB,A], y [TB,E], W [A,E], ||W_a|| [1,A] -> out [1,TB]."""
    x = x_ref[...].astype(jnp.float32)          # [TB, A]
    y = y_ref[...].astype(jnp.float32)          # [TB, E]
    w = w_ref[...].astype(jnp.float32)          # [A,  E]
    wnorm = wn_ref[...].astype(jnp.float32)     # [1,  A]  (precomputed ||W_a||)

    # F.normalize(x[b,a]*W[a,:], dim=-1, eps=1e-12) == scale[b,a] * W[a,:]
    # (zero rows of W or zero x give scale*0 -> 0, matching PyTorch exactly)
    denom = jnp.maximum(jnp.abs(x) * wnorm, 1e-12)              # [TB, A]
    scale = x / denom                                           # [TB, A]

    # att[b,a] = <emb[b,a,:], y[b,:]> = scale[b,a] * (y @ W.T)[b,a]     (MXU)
    yw = jax.lax.dot_general(y, w, (((1,), (1,)), ((), ())),
                             preferred_element_type=jnp.float32)  # [TB, A]

    # tilde_u[b,:] = sum_a (att*scale)[b,a] * W[a,:];  c = scale^2 * yw
    c = (scale * scale) * yw                                     # [TB, A]
    if num_asp <= 16:
        # Skinny K=A contraction on the VPU: A broadcast-mul-adds over [TB, E].
        tilde_u = jnp.zeros(y.shape, jnp.float32)
        for a in range(num_asp):                                 # static unroll
            tilde_u = tilde_u + c[:, a:a + 1] * w[a:a + 1, :]
    else:
        tilde_u = jnp.dot(c, w, preferred_element_type=jnp.float32)

    # pairwise_distance(y, tilde_u) with PyTorch default eps = 1e-6.
    diff = y - tilde_u + 1e-6
    dist = jnp.sqrt(jnp.sum(diff * diff, axis=-1))[None, :]      # [1, TB]

    # Ragged last block: zero out rows >= batch (garbage stays row-local, but
    # keep the output deterministic / NaN-free).
    if batch % tb != 0:
        col = jax.lax.broadcasted_iota(jnp.int32, (1, tb), 1)
        row_idx = pl.program_id(0) * tb + col
        dist = jnp.where(row_idx < batch, dist, 0.0)

    out_ref[...] = dist


def interpret_forward(x, y, W, *, tb_max=1024):
    """x: [B, A], y: [B, E], W: [A, E]  ->  [B] f32 interpret loss."""
    x = jnp.asarray(x)
    y = jnp.asarray(y)
    W = jnp.asarray(W)
    B, A = x.shape
    B2, E = y.shape
    assert B == B2 and W.shape == (A, E)

    # Hoisted once: per-aspect row norms of W (tiny [A] vector, resident tile).
    w_norm = jnp.sqrt(jnp.sum(jnp.asarray(W, jnp.float32) ** 2,
                              axis=-1)).reshape(1, A)

    # Batch tile: one block for modest B; otherwise a 128-multiple tile capped
    # so the double-buffered working set fits every generation's scoped VMEM.
    if B <= tb_max:
        tb = B
    else:
        tb = tb_max
        while tb > 128 and 4 * tb * (E + A) * 4 > 12 * 1024 * 1024:
            tb //= 2
    grid = pl.cdiv(B, tb)

    # Rough working-set estimate (double-buffered inputs/outputs + resident W).
    in_bytes = max(x.dtype.itemsize, y.dtype.itemsize)
    est = (2 * tb * (E + A) * in_bytes * 2 + 2 * tb * 4 + A * E * 4 + A * 4)
    cp_kwargs = dict(dimension_semantics=("parallel",))
    if est * 3 > 16 * 1024 * 1024:
        cp_kwargs["vmem_limit_bytes"] = min(int(est * 3), 48 * 1024 * 1024)

    cost = pl.CostEstimate(
        flops=int(4 * B * A * E + 8 * B * E + 6 * B * A),
        transcendentals=int(B + A),
        bytes_accessed=int(x.size * x.dtype.itemsize
                           + y.size * y.dtype.itemsize
                           + W.size * W.dtype.itemsize
                           + A * 4 + B * 4),
    )

    out = pl.pallas_call(
        functools.partial(_interpret_kernel, num_asp=A, batch=B, tb=tb),
        out_shape=jax.ShapeDtypeStruct((1, B), jnp.float32),
        grid_spec=pltpu.PrefetchScalarGridSpec(
            num_scalar_prefetch=0,
            grid=(grid,),
            in_specs=[
                pl.BlockSpec((tb, A), lambda i: (i, 0)),   # x batch tile
                pl.BlockSpec((tb, E), lambda i: (i, 0)),   # y batch tile
                pl.BlockSpec((A, E), lambda i: (0, 0)),    # W resident
                pl.BlockSpec((1, A), lambda i: (0, 0)),    # ||W_a|| resident
            ],
            out_specs=pl.BlockSpec((1, tb), lambda i: (0, i)),
        ),
        compiler_params=pltpu.CompilerParams(**cp_kwargs),
        cost_estimate=cost,
    )(x, y, W, w_norm)
    return out[0]


def interpret_reference(x, y, W):
    """Pure-JAX reference mirroring the PyTorch module (materializes emb)."""
    x = jnp.asarray(x, jnp.float32)
    y = jnp.asarray(y, jnp.float32)
    W = jnp.asarray(W, jnp.float32)
    emb = x[:, :, None] * W[None, :, :]
    norm = jnp.sqrt(jnp.sum(emb * emb, axis=-1, keepdims=True))
    emb_n = emb / jnp.maximum(norm, 1e-12)
    att = jnp.einsum("bae,be->ba", emb_n, y)
    tilde_u = jnp.einsum("ba,bae->be", att, emb_n)
    diff = y - tilde_u + 1e-6
    return jnp.sqrt(jnp.sum(diff * diff, axis=-1))


if __name__ == "__main__":
    key = jax.random.PRNGKey(0)
    k_w, k_x, k_y, k_w2, k_x2, k_y2 = jax.random.split(key, 6)

    # Case 1: tiny shapes from the module spec (batch=2, num_asp=4, dim_emb=32)
    # — single-block path, block shapes equal the full array dims.
    B, A, E = 2, 4, 32
    W = jax.random.normal(k_w, (A, E), dtype=jnp.float32)
    x = jax.random.bernoulli(k_x, p=0.5, shape=(B, A)).astype(jnp.float32)
    y = jax.random.normal(k_y, (B, E), dtype=jnp.float32)

    out = jax.block_until_ready(interpret_forward(x, y, W))
    ref = interpret_reference(x, y, W)
    assert out.shape == (B,)
    assert jnp.allclose(out, ref, atol=2e-4, rtol=2e-4), (out, ref)

    # Case 2: larger, non-multiple batch — exercises the multi-step grid,
    # ragged boundary block (no wrapper-side pad) and in-kernel row masking.
    B2, A2, E2 = 1100, 8, 128
    W2 = jax.random.normal(k_w2, (A2, E2), dtype=jnp.float32)
    x2 = jax.random.bernoulli(k_x2, p=0.5, shape=(B2, A2)).astype(jnp.float32)
    y2 = jax.random.normal(k_y2, (B2, E2), dtype=jnp.float32)

    out2 = jax.block_until_ready(interpret_forward(x2, y2, W2))
    ref2 = interpret_reference(x2, y2, W2)
    assert out2.shape == (B2,)
    assert jnp.allclose(out2, ref2, atol=2e-4, rtol=2e-4), (out2, ref2)

    print("KERNEL_OK")
</pallas_src>

<mosaic_0001>
module attributes {stable_mosaic.version = 11 : i64} {
  func.func @_interpret_kernel(%arg0: i32, %arg1: memref<2x4xf32, #tpu.memory_space<vmem>>, %arg2: memref<2x32xf32, #tpu.memory_space<vmem>>, %arg3: memref<4x32xf32, #tpu.memory_space<vmem>>, %arg4: memref<1x4xf32, #tpu.memory_space<vmem>>, %arg5: memref<1x2xf32, #tpu.memory_space<vmem>>) attributes {dimension_semantics = [#tpu.dimension_semantics<parallel>], iteration_bounds = array<i64: 1>, scalar_prefetch = 0 : i64, scratch_operands = 0 : i64, tpu.core_type = #tpu.core_type<tc>, window_params = [{transform_indices = @transform_0, window_bounds = array<i64: 2, 4>}, {transform_indices = @transform_1, window_bounds = array<i64: 2, 32>}, {pipeline_mode = #tpu.pipeline_mode<synchronous>, transform_indices = @transform_2, window_bounds = array<i64: 4, 32>}, {pipeline_mode = #tpu.pipeline_mode<synchronous>, transform_indices = @transform_3, window_bounds = array<i64: 1, 4>}, {transform_indices = @transform_4, window_bounds = array<i64: 1, 2>}]} {
    %c0 = arith.constant 0 : index
    %c0_0 = arith.constant 0 : index
    %0 = vector.load %arg1[%c0, %c0_0] : memref<2x4xf32, #tpu.memory_space<vmem>>, vector<2x4xf32>
    %c0_1 = arith.constant 0 : index
    %c0_2 = arith.constant 0 : index
    %1 = vector.load %arg2[%c0_1, %c0_2] : memref<2x32xf32, #tpu.memory_space<vmem>>, vector<2x32xf32>
    %c0_3 = arith.constant 0 : index
    %c0_4 = arith.constant 0 : index
    %2 = vector.load %arg3[%c0_3, %c0_4] : memref<4x32xf32, #tpu.memory_space<vmem>>, vector<4x32xf32>
    %c0_5 = arith.constant 0 : index
    %c0_6 = arith.constant 0 : index
    %3 = vector.load %arg4[%c0_5, %c0_6] : memref<1x4xf32, #tpu.memory_space<vmem>>, vector<1x4xf32>
    %4 = math.absf %0 : vector<2x4xf32>
    %5 = vector.broadcast %3 : vector<1x4xf32> to vector<2x4xf32>
    %6 = arith.mulf %4, %5 : vector<2x4xf32>
    %cst = arith.constant 9.99999996E-13 : f32
    %7 = vector.broadcast %cst : f32 to vector<2x4xf32>
    %8 = arith.maximumf %6, %7 : vector<2x4xf32>
    %9 = arith.divf %0, %8 : vector<2x4xf32>
    %cst_7 = arith.constant dense<0.000000e+00> : vector<2x4xf32>
    %10 = tpu.matmul %1, %2, %cst_7 {dimension_numbers = #tpu.dot_dimension_numbers<[1], [1], [0], [0], [0, 0, 1, 0], [], []>} : vector<2x32xf32>, vector<4x32xf32>, vector<2x4xf32> -> vector<2x4xf32>
    %11 = arith.mulf %9, %9 : vector<2x4xf32>
    %12 = arith.mulf %11, %10 : vector<2x4xf32>
    %cst_8 = arith.constant 0.000000e+00 : f32
    %13 = vector.broadcast %cst_8 : f32 to vector<2x32xf32>
    %14 = vector.extract_strided_slice %12 {offsets = [0, 0], sizes = [2, 1], strides = [1, 1]} : vector<2x4xf32> to vector<2x1xf32>
    %15 = vector.extract_strided_slice %2 {offsets = [0, 0], sizes = [1, 32], strides = [1, 1]} : vector<4x32xf32> to vector<1x32xf32>
    %16 = vector.broadcast %14 : vector<2x1xf32> to vector<2x32xf32>
    %17 = vector.broadcast %15 : vector<1x32xf32> to vector<2x32xf32>
    %18 = arith.mulf %16, %17 : vector<2x32xf32>
    %19 = arith.addf %13, %18 : vector<2x32xf32>
    %20 = vector.extract_strided_slice %12 {offsets = [0, 1], sizes = [2, 1], strides = [1, 1]} : vector<2x4xf32> to vector<2x1xf32>
    %21 = vector.extract_strided_slice %2 {offsets = [1, 0], sizes = [1, 32], strides = [1, 1]} : vector<4x32xf32> to vector<1x32xf32>
    %22 = vector.broadcast %20 : vector<2x1xf32> to vector<2x32xf32>
    %23 = vector.broadcast %21 : vector<1x32xf32> to vector<2x32xf32>
    %24 = arith.mulf %22, %23 : vector<2x32xf32>
    %25 = arith.addf %19, %24 : vector<2x32xf32>
    %26 = vector.extract_strided_slice %12 {offsets = [0, 2], sizes = [2, 1], strides = [1, 1]} : vector<2x4xf32> to vector<2x1xf32>
    %27 = vector.extract_strided_slice %2 {offsets = [2, 0], sizes = [1, 32], strides = [1, 1]} : vector<4x32xf32> to vector<1x32xf32>
    %28 = vector.broadcast %26 : vector<2x1xf32> to vector<2x32xf32>
    %29 = vector.broadcast %27 : vector<1x32xf32> to vector<2x32xf32>
    %30 = arith.mulf %28, %29 : vector<2x32xf32>
    %31 = arith.addf %25, %30 : vector<2x32xf32>
    %32 = vector.extract_strided_slice %12 {offsets = [0, 3], sizes = [2, 1], strides = [1, 1]} : vector<2x4xf32> to vector<2x1xf32>
    %33 = vector.extract_strided_slice %2 {offsets = [3, 0], sizes = [1, 32], strides = [1, 1]} : vector<4x32xf32> to vector<1x32xf32>
    %34 = vector.broadcast %32 : vector<2x1xf32> to vector<2x32xf32>
    %35 = vector.broadcast %33 : vector<1x32xf32> to vector<2x32xf32>
    %36 = arith.mulf %34, %35 : vector<2x32xf32>
    %37 = arith.addf %31, %36 : vector<2x32xf32>
    %38 = arith.subf %1, %37 : vector<2x32xf32>
    %cst_9 = arith.constant 9.99999997E-7 : f32
    %39 = vector.broadcast %cst_9 : f32 to vector<2x32xf32>
    %40 = arith.addf %38, %39 : vector<2x32xf32>
    %41 = arith.mulf %40, %40 : vector<2x32xf32>
    %cst_10 = arith.constant dense<0.000000e+00> : vector<2xf32>
    %42 = vector.multi_reduction <add>, %41, %cst_10 [1] : vector<2x32xf32> to vector<2xf32>
    %43 = math.sqrt %42 : vector<2xf32>
    %44 = vector.shape_cast %43 : vector<2xf32> to vector<1x2xf32>
    %c0_11 = arith.constant 0 : index
    %c0_12 = arith.constant 0 : index
    %45 = vector.load %arg5[%c0_11, %c0_12] : memref<1x2xf32, #tpu.memory_space<vmem>>, vector<1x2xf32>
    tpu.vector_store %arg5[%c0_11, %c0_12], %44 {strides = array<i32>} : memref<1x2xf32, #tpu.memory_space<vmem>>, vector<1x2xf32>,
    return
  }
  func.func @transform_0(%arg0: i32) -> (i32, i32) {
    %c0_i32 = arith.constant 0 : i32
    %c0_i32_0 = arith.constant 0 : i32
    return %arg0, %c0_i32 : i32, i32
  }
  func.func @transform_1(%arg0: i32) -> (i32, i32) {
    %c0_i32 = arith.constant 0 : i32
    %c0_i32_0 = arith.constant 0 : i32
    return %arg0, %c0_i32 : i32, i32
  }
  func.func @transform_2(%arg0: i32) -> (i32, i32) {
    %c0_i32 = arith.constant 0 : i32
    %c0_i32_0 = arith.constant 0 : i32
    %c0_i32_1 = arith.constant 0 : i32
    return %c0_i32, %c0_i32_0 : i32, i32
  }
  func.func @transform_3(%arg0: i32) -> (i32, i32) {
    %c0_i32 = arith.constant 0 : i32
    %c0_i32_0 = arith.constant 0 : i32
    %c0_i32_1 = arith.constant 0 : i32
    return %c0_i32, %c0_i32_0 : i32, i32
  }
  func.func @transform_4(%arg0: i32) -> (i32, i32) {
    %c0_i32 = arith.constant 0 : i32
    %c0_i32_0 = arith.constant 0 : i32
    return %c0_i32, %arg0 : i32, i32
  }
}

</mosaic_0001>

<bundles_post_ra>
// kernel: tpu_custom_call.1
= control target key start
LH: loop header
LB: loop body
LE: loop exit
PB: predicated region body
PF: predicated region fallthrough
CT: control target
= control target key end

     0   :  { %9 = vsyncpa [#allocation3], 0  ;;  %s356_s0 = inlined_call_operand.hbm [shape: f32[2,4], index: 0, kind: input, shape index: {}]   ;;  %s357_s1 = inlined_call_operand.hbm [shape: f32[2,32], index: 1, kind: input, shape index: {}]   ;;  %s358_s2 = inlined_call_operand.hbm [shape: f32[4,32], index: 2, kind: input, shape index: {}]   ;;  %s359_s3 = inlined_call_operand.vmem [shape: f32[1,4], index: 3, kind: input, shape index: {}]   ;;  %s360_s4 = inlined_call_operand.hbm [shape: f32[1,2], index: 4, kind: output, shape index: {}]  }
   0x1   :  { %10 = vsyncpa [#allocation6], 0  ;;  %s28_s17 = sshll.u32 %s357_s1, 4  ;;  %s29_s17 = int_to_ptr.hbm [resolvable:$true] %s28_s17 }
   0x2   :  { %11 = vsyncpa [#allocation4], 0  ;;  %s308_s18 = smov [#allocation5]   ;;  %s17_s22 = sshll.u32 %s356_s0, 4  ;;  %s18_s22 = int_to_ptr.hbm [resolvable:$true] %s17_s22 }
   0x3   :  { %s30_s19 = sshll.u32 %s308_s18, 4  ;;  %s309_s23 = smov [#allocation2]   ;;  %s31_s19 = int_to_ptr.vmem [resolvable:$true] %s30_s19 }
   0x4   :  { %33 = dma.hbm_to_vmem [thread:$0]  %s29_s17, 32, %s31_s19, [#allocation6]  }
   0x5   :  { %s19_s24 = sshll.u32 %s309_s23, 4  ;;  %s39_s27 = sshll.u32 %s358_s2, 4  ;;  %s20_s24 = int_to_ptr.vmem [resolvable:$true] %s19_s24  ;;  %s40_s27 = int_to_ptr.hbm [resolvable:$true] %s39_s27 }
   0x6   :  { %22 = dma.hbm_to_vmem [thread:$0]  %s18_s22, 32, %s20_s24, [#allocation3]  }
   0x7   :  { %s310_s1 = smov [#allocation7]  }
   0x8   :  { %s41_s28 = sshll.u32 %s310_s1, 4  ;;  %s42_s28 = int_to_ptr.vmem [resolvable:$true] %s41_s28 }
   0x9   :  { %44 = dma.hbm_to_vmem [thread:$0]  %s40_s27, 64, %s42_s28, [#allocation6]  }
   0xa   :  { %302 = dma.done.wait [#allocation3], 32  }
   0xb   :  { %303 = vsyncadd [#allocation3], 4294967264 }
   0xc   :  { %304 = dma.done.wait [#allocation6], 96  }
   0xd   :  { %305 = vsyncadd [#allocation6], 4294967200  ;;  %vm84_vm0 = vcmask 261120   ;;  %v61_v0 = vld [vmem:[#allocation7] sm:$0xf]  ;;  %v311_v8 = vmov 2   ;;  %v162_v50 = vlaneseq }
   0xe   :  { %186 = vmatpush.xpose.msk.msra.mxu0 %vm84_vm0, %v61_v0  ;;  %v60_v1 = vld [vmem:[#allocation5] sm:$0x3]  ;;  %v59_v2 = vld [vmem:[#allocation2] sm:$0x3]  ;;  %198 = vset.pattern.permute.xlu1 %v311_v8  ;;  %v312_v9 = vmov 0   ;;  %v313_v23 = vmov 3  }
   0xf   :  { %v63_v3 = vand.u32 2147483647, %v59_v2  ;;  %v201_v4 = vld [vmem:[%s359_s3] ss:$0 sm:$0xff]  ;;  %196 = vset.pattern.permute.xlu0 %v312_v9  ;;  %v314_v24 = vmov 1   ;;  %v118_v27 = vperm.slane %v61_v0, 0 }
  0x10   :  { %v125_v28 = vperm.slane %v61_v0, 1  ;;  %v132_v29 = vperm.slane %v61_v0, 2  ;;  %v139_v32 = vperm.slane %v61_v0, 3  ;;  %vm145_vm5 = vcmask 254976   ;;  %s315_s3 = smov [#allocation8]   ;;  %s175_s6 = sshll.u32 %s360_s4, 4  ;;  %s176_s6 = int_to_ptr.hbm [resolvable:$true] %s175_s6 }
  0x11   :  { %187 = vmatmul.msk.f32.vlgmr.msra.gmra.mxu0 %vm84_vm0, %v60_v1  ;;  %v67_v5 = vmul.f32 %v201_v4, %v63_v3  ;;  %v163_v53 = vand.u32 127, %v162_v50  ;;  %s173_s29 = sshll.u32 %s315_s3, 4  ;;  %vm166_vm8 = vcmask 8192   ;;  %s174_s29 = int_to_ptr.vmem [resolvable:$true] %s173_s29 }
  0x13   :  { %v68_v6 = vmax.f32 %v67_v5, 1e-12 }
  0x15   :  { %202 = vrcp.f32 %v68_v6  ;;  %vm74_vm1 = vweird.f32 %v68_v6  ;;  %v80_v13 = vand.u32 2147483648, %v68_v6  ;;  %v78_v15 = vand.u32 2147483647, %v68_v6 }
  0x17   :  { %v81_v16 = vor.u32 1.1754944e-38, %v80_v13  ;;  %vm79_vm4 = vcmp.eq.f32.partialorder %v78_v15, 8.507059e+37 }
  0x1b   :  { %v203_v7 = vpop.eup %202 }
  0x1c   :  { %v70_v10 = vmul.f32 %v203_v7, %v68_v6  ;;  %vm75_vm2 = vweird.f32 %v203_v7 }
  0x1d   :  { %vm76_vm3 = vmor %vm74_vm1, %vm75_vm2 }
  0x1e   :  { %v71_v11 = vsub.f32 1.0, %v70_v10 }
  0x20   :  { %v72_v12 = vmul.f32 %v203_v7, %v71_v11 }
  0x22   :  { %v73_v14 = vadd.f32 %v203_v7, %v72_v12 }
  0x24   :  { %v77_v17 = vsel %vm76_vm3, %v203_v7, %v73_v14 }
  0x25   :  { %v82_v18 = vsel %vm79_vm4, %v81_v16, %v77_v17 }
  0x26   :  { %v83_v19 = vmul.f32 %v82_v18, %v59_v2 }
  0x28   :  { %v111_v20 = vmul.f32 %v83_v19, %v83_v19 }
  0x8e   :  { %v108_v21 = vpop.f32.mrf.mxu0 }
  0x8f   :  { %v112_v22 = vmul.f32 %v111_v20, %v108_v21 }
  0x91   :  { %129 = vperm.xlu1 %198, %v112_v22   ;;  %115 = vperm.xlu0 %196, %v112_v22  }
  0x99   :  { %199 = vset.pattern.permute.xlu1 %v313_v23  ;;  %197 = vset.pattern.permute.xlu0 %v314_v24 }
  0x9a   :  { %136 = vperm.xlu1 %199, %v112_v22   ;;  %122 = vperm.xlu0 %197, %v112_v22  }
  0xa2   :  { %200 = vset.pattern.permute.xlu0 %v313_v23 }
 0x103   :  { %v116_v25 = vpop.permute.xlu0 %115  ;;  %v130_v26 = vpop.permute.xlu1 %129 }
 0x104   :  { %v119_v31 = vmul.f32 %v118_v27, %v116_v25  ;;  %v133_v35 = vmul.f32 %v132_v29, %v130_v26 }
 0x10c   :  { %v123_v30 = vpop.permute.xlu0 %122  ;;  %v137_v34 = vpop.permute.xlu1 %136 }
 0x10d   :  { %v126_v33 = vmul.f32 %v125_v28, %v123_v30  ;;  %v140_v37 = vmul.f32 %v139_v32, %v137_v34 }
 0x10f   :  { %v127_v36 = vadd.f32 %v126_v33, %v119_v31 }
 0x111   :  { %v134_v38 = vadd.f32 %v133_v35, %v127_v36 }
 0x113   :  { %v141_v39 = vadd.f32 %v140_v37, %v134_v38 }
 0x115   :  { %v142_v40 = vsub.f32 %v60_v1, %v141_v39 }
 0x117   :  { %v143_v41 = vadd.f32 1e-06, %v142_v40 }
 0x119   :  { %v144_v42 = vmul.f32 %v143_v41, %v143_v41 }
 0x11b   :  { %v146_v43 = vsel %vm145_vm5, %v144_v42, 0.0 }
 0x11c   :  { %147 = vadd.xlane.f32.xlu2 %v146_v43 }
 0x18f   :  { %v148_v44 = vpop.xlane.xlu2 %147 }
 0x190   :  { %204 = vrsqrt.f32 %v148_v44  ;;  %vm156_vm6 = vcmp.eq.f32.partialorder %v148_v44, inf  ;;  %v159_v54 = vand.u32 2147483648, %v148_v44  ;;  %vm158_vm7 = vcmp.eq.f32.partialorder %v148_v44, 0.0 }
 0x196   :  { %v205_v45 = vpop.eup %204 }
 0x197   :  { %v150_v46 = vmul.f32 %v205_v45, %v148_v44 }
 0x199   :  { %v151_v47 = vmul.f32 %v205_v45, %v150_v46 }
 0x19b   :  { %v152_v48 = vmul.f32 0.5, %v151_v47 }
 0x19d   :  { %v153_v49 = vsub.f32 1.5, %v152_v48 }
 0x19f   :  { %v154_v51 = vmul.f32 %v205_v45, %v153_v49 }
 0x1a1   :  { %v155_v52 = vmul.f32 %v154_v51, %v148_v44 }
 0x1a3   :  { %v157_v55 = vsel %vm156_vm6, %v148_v44, %v155_v52 }
 0x1a4   :  { %v160_v56 = vsel %vm158_vm7, %v159_v54, %v157_v55 }
 0x1a5   :  { %v164_v57 = vperm.slane %v160_v56, %v163_v53 }
 0x1a7   :  { %167 = vst.msk [vmem:[#allocation8] sm:$0x1] %vm166_vm8, %v164_v57 }
 0x1a8   :  { %178 = dma.vmem_to_hbm [thread:$0]  %s174_s29, 16, %s176_s6, [#allocation4]  }
 0x1a9   :  { %306 = dma.done.wait [#allocation4], 16  }
 0x1aa   :  { %307 = vsyncadd [#allocation4], 4294967280 }
 0x1ab   :  { %183 = vsyncpa [#allocation3], 1 }
 0x1ac   :  { %184 = vsyncpa [#allocation6], 1 }
 0x1ad   :  { %185 = vsyncpa [#allocation4], 1 }

</bundles_post_ra>
